<compile_context>
chip_gen: v7x
topology: tpu7x:2x2x1
jax: 0.10.0
libtpu: 0.0.40
codegen_flags: <defaults>
</compile_context>

<pallas_src>
import functools

import jax
import jax.numpy as jnp
from jax.experimental import pallas as pl
from jax.experimental.pallas import tpu as pltpu

HIDDEN_LAYER = 3
LAYER_DIFF = 7
N_LAYERS = 2 * HIDDEN_LAYER
PAD = 128  # lane-padded feature width; requires input_dimension + 21 <= 128


def _mida_kernel(x_ref, w_ref, b_ref, o_ref, h_pad):
    """x_ref: (TB, D) f32, w_ref: (6, PAD, PAD) bf16, b_ref: (6, 1, PAD) f32,
    o_ref: (TB, D) f32, h_pad: (TB, PAD) f32 VMEM scratch."""
    TB, D = x_ref.shape

    # Zero-pad features to 128 lanes inside VMEM (masked stores, no HBM pass).
    h_pad[:, :D] = x_ref[...]
    if D < PAD:
        h_pad[:, D:] = jnp.zeros((TB, PAD - D), jnp.float32)
    h = h_pad[...]  # (TB, PAD) f32

    # 6 chained Linear+tanh layers: bf16 MXU matmul, f32 accumulate/bias/tanh.
    for i in range(N_LAYERS):
        z = jnp.dot(h.astype(jnp.bfloat16), w_ref[i],
                    preferred_element_type=jnp.float32) + b_ref[i]
        h = jnp.tanh(z)

    o_ref[...] = h[:, :D].astype(o_ref.dtype)


@functools.partial(jax.jit, static_argnames=("block_b",))
def mida_forward(x, w_packed_bf16, b_packed, *, block_b=1024):
    """x: (B, D) f32.  w_packed_bf16: (6, PAD, PAD) bf16.  b_packed: (6, 1, PAD) f32.
    Returns (B, D) f32."""
    B, D = x.shape
    assert D + HIDDEN_LAYER * LAYER_DIFF <= PAD, "input_dimension too large for PAD"

    # Batch tile: multiple of 8 (or the full batch); 512-2048 is a good range
    # for large B.  block_b is sized well under v7x's 32 MiB scoped VMEM.
    TB = B if B <= block_b else block_b
    grid = (pl.cdiv(B, TB),)

    cost = pl.CostEstimate(
        flops=2 * B * N_LAYERS * PAD * PAD,
        transcendentals=N_LAYERS * B * PAD,
        bytes_accessed=2 * B * D * 4 + N_LAYERS * PAD * PAD * 2 + N_LAYERS * PAD * 4,
    )

    return pl.pallas_call(
        _mida_kernel,
        out_shape=jax.ShapeDtypeStruct((B, D), jnp.float32),
        grid_spec=pltpu.PrefetchScalarGridSpec(
            num_scalar_prefetch=0,
            grid=grid,
            in_specs=[
                pl.BlockSpec((TB, D), lambda i: (i, 0)),                 # x tile
                pl.BlockSpec((N_LAYERS, PAD, PAD), lambda i: (0, 0, 0)),  # weights (resident)
                pl.BlockSpec((N_LAYERS, 1, PAD), lambda i: (0, 0, 0)),    # biases  (resident)
            ],
            out_specs=pl.BlockSpec((TB, D), lambda i: (i, 0)),
            scratch_shapes=[pltpu.VMEM((TB, PAD), jnp.float32)],
        ),
        compiler_params=pltpu.CompilerParams(
            dimension_semantics=("parallel",),  # shard batch tiles across v7x's 2 TCs
        ),
        cost_estimate=cost,
    )(x, w_packed_bf16, b_packed)


def make_mida_params(key, input_dimension):
    """Deterministic params mimicking nn.Linear init (uniform +-1/sqrt(fan_in)).

    Each layer is stored as a PAD x PAD weight (applied as x @ W, i.e. the
    transpose of PyTorch's (out, in) convention) plus a (1, PAD) bias, zeros
    outside the true (in_dim, out_dim) block.  Returns f32 packed params.
    """
    dims = [input_dimension + i * LAYER_DIFF for i in range(HIDDEN_LAYER + 1)]
    enc = list(zip(dims[:-1], dims[1:]))            # encoder (in, out) going up
    dec = [(o, i) for (i, o) in reversed(enc)]      # reversed decoder going down
    layer_dims = enc + dec

    w_list, b_list = [], []
    for fan_in, fan_out in layer_dims:
        key, kw, kb = jax.random.split(key, 3)
        bound = float(fan_in) ** -0.5
        w = jax.random.uniform(kw, (fan_in, fan_out), jnp.float32, -bound, bound)
        b = jax.random.uniform(kb, (fan_out,), jnp.float32, -bound, bound)
        w_list.append(jnp.zeros((PAD, PAD), jnp.float32).at[:fan_in, :fan_out].set(w))
        b_list.append(jnp.zeros((1, PAD), jnp.float32).at[0, :fan_out].set(b))

    w_packed = jnp.stack(w_list)   # (6, PAD, PAD) f32
    b_packed = jnp.stack(b_list)   # (6, 1, PAD)  f32
    return w_packed, b_packed, layer_dims


def mida_reference(x, w_packed, b_packed, layer_dims, *, quantize_activations=False):
    """Pure-JAX reference on the unpadded slices (mirrors the PyTorch forward).
    quantize_activations=True mirrors the kernel's bf16 MXU inputs."""
    w = w_packed.astype(jnp.float32)
    h = x
    for i, (fan_in, fan_out) in enumerate(layer_dims):
        hi = h.astype(jnp.bfloat16).astype(jnp.float32) if quantize_activations else h
        h = jnp.tanh(hi @ w[i, :fan_in, :fan_out] + b_packed[i, 0, :fan_out])
    return h


if __name__ == "__main__":
    key = jax.random.PRNGKey(0)
    kx, kp = jax.random.split(key)

    B, D = 256, 32  # layer dims: 32 -> 39 -> 46 -> 53 -> 46 -> 39 -> 32
    x = jax.random.normal(kx, (B, D), jnp.float32)

    w_packed, b_packed, layer_dims = make_mida_params(kp, D)
    w_bf16 = w_packed.astype(jnp.bfloat16)  # one-time cast (inference weight load)

    out = mida_forward(x, w_bf16, b_packed, block_b=128)  # grid of 2 batch tiles
    out = jax.block_until_ready(out)
    assert out.shape == (B, D), out.shape

    # Tight check: same bf16 weights + bf16-rounded activations, f32 accumulation.
    ref_q = mida_reference(x, w_bf16.astype(jnp.float32)[None][0], b_packed,
                           layer_dims, quantize_activations=True)
    err_q = float(jnp.max(jnp.abs(out - ref_q)))
    assert err_q < 1e-3, err_q

    # Loose check vs. the original module's full-f32 math (bf16 rounding only).
    ref_f32 = mida_reference(x, w_packed, b_packed, layer_dims)
    err_f32 = float(jnp.max(jnp.abs(out - ref_f32)))
    assert err_f32 < 1e-1, err_f32

    print("KERNEL_OK")
</pallas_src>

<mosaic_0001>
module attributes {stable_mosaic.version = 11 : i64} {
  func.func @_mida_kernel(%arg0: i32, %arg1: memref<128x32xf32, #tpu.memory_space<vmem>>, %arg2: memref<6x128x128xbf16, #tpu.memory_space<vmem>>, %arg3: memref<6x1x128xf32, #tpu.memory_space<vmem>>, %arg4: memref<128x32xf32, #tpu.memory_space<vmem>>, %arg5: memref<128x128xf32, #tpu.memory_space<vmem>>) attributes {dimension_semantics = [#tpu.dimension_semantics<parallel>], iteration_bounds = array<i64: 2>, scalar_prefetch = 0 : i64, scratch_operands = 1 : i64, tpu.core_type = #tpu.core_type<tc>, window_params = [{transform_indices = @transform_0, window_bounds = array<i64: 128, 32>}, {pipeline_mode = #tpu.pipeline_mode<synchronous>, transform_indices = @transform_1, window_bounds = array<i64: 6, 128, 128>}, {pipeline_mode = #tpu.pipeline_mode<synchronous>, transform_indices = @transform_2, window_bounds = array<i64: 6, 1, 128>}, {transform_indices = @transform_3, window_bounds = array<i64: 128, 32>}]} {
    %c0 = arith.constant 0 : index
    %c0_0 = arith.constant 0 : index
    %0 = vector.load %arg1[%c0, %c0_0] : memref<128x32xf32, #tpu.memory_space<vmem>>, vector<128x32xf32>
    %c0_1 = arith.constant 0 : index
    %c0_2 = arith.constant 0 : index
    %1 = vector.load %arg5[%c0_1, %c0_2] : memref<128x128xf32, #tpu.memory_space<vmem>>, vector<128x32xf32>
    tpu.vector_store %arg5[%c0_1, %c0_2], %0 {strides = array<i32>} : memref<128x128xf32, #tpu.memory_space<vmem>>, vector<128x32xf32>,
    %cst = arith.constant 0.000000e+00 : f32
    %2 = vector.broadcast %cst : f32 to vector<128x96xf32>
    %c0_3 = arith.constant 0 : index
    %c32 = arith.constant 32 : index
    %3 = vector.load %arg5[%c0_3, %c32] : memref<128x128xf32, #tpu.memory_space<vmem>>, vector<128x96xf32>
    tpu.vector_store %arg5[%c0_3, %c32], %2 {strides = array<i32>} : memref<128x128xf32, #tpu.memory_space<vmem>>, vector<128x96xf32>,
    %c0_4 = arith.constant 0 : index
    %c0_5 = arith.constant 0 : index
    %4 = vector.load %arg5[%c0_4, %c0_5] : memref<128x128xf32, #tpu.memory_space<vmem>>, vector<128x128xf32>
    %5 = arith.truncf %4 : vector<128x128xf32> to vector<128x128xbf16>
    %c0_6 = arith.constant 0 : index
    %c0_7 = arith.constant 0 : index
    %c0_8 = arith.constant 0 : index
    %6 = vector.load %arg2[%c0_6, %c0_7, %c0_8] : memref<6x128x128xbf16, #tpu.memory_space<vmem>>, vector<1x128x128xbf16>
    %7 = vector.shape_cast %6 : vector<1x128x128xbf16> to vector<128x128xbf16>
    %cst_9 = arith.constant dense<0.000000e+00> : vector<128x128xf32>
    %8 = tpu.matmul %5, %7, %cst_9 {dimension_numbers = #tpu.dot_dimension_numbers<[1], [0], [0], [1], [0, 0, 1, 1], [], []>} : vector<128x128xbf16>, vector<128x128xbf16>, vector<128x128xf32> -> vector<128x128xf32>
    %c0_10 = arith.constant 0 : index
    %c0_11 = arith.constant 0 : index
    %c0_12 = arith.constant 0 : index
    %9 = vector.load %arg3[%c0_10, %c0_11, %c0_12] : memref<6x1x128xf32, #tpu.memory_space<vmem>>, vector<1x1x128xf32>
    %10 = vector.shape_cast %9 : vector<1x1x128xf32> to vector<1x128xf32>
    %11 = vector.broadcast %10 : vector<1x128xf32> to vector<128x128xf32>
    %12 = arith.addf %8, %11 : vector<128x128xf32>
    %13 = math.tanh %12 : vector<128x128xf32>
    %14 = arith.truncf %13 : vector<128x128xf32> to vector<128x128xbf16>
    %c1 = arith.constant 1 : index
    %c0_13 = arith.constant 0 : index
    %c0_14 = arith.constant 0 : index
    %15 = vector.load %arg2[%c1, %c0_13, %c0_14] : memref<6x128x128xbf16, #tpu.memory_space<vmem>>, vector<1x128x128xbf16>
    %16 = vector.shape_cast %15 : vector<1x128x128xbf16> to vector<128x128xbf16>
    %cst_15 = arith.constant dense<0.000000e+00> : vector<128x128xf32>
    %17 = tpu.matmul %14, %16, %cst_15 {dimension_numbers = #tpu.dot_dimension_numbers<[1], [0], [0], [1], [0, 0, 1, 1], [], []>} : vector<128x128xbf16>, vector<128x128xbf16>, vector<128x128xf32> -> vector<128x128xf32>
    %c1_16 = arith.constant 1 : index
    %c0_17 = arith.constant 0 : index
    %c0_18 = arith.constant 0 : index
    %18 = vector.load %arg3[%c1_16, %c0_17, %c0_18] : memref<6x1x128xf32, #tpu.memory_space<vmem>>, vector<1x1x128xf32>
    %19 = vector.shape_cast %18 : vector<1x1x128xf32> to vector<1x128xf32>
    %20 = vector.broadcast %19 : vector<1x128xf32> to vector<128x128xf32>
    %21 = arith.addf %17, %20 : vector<128x128xf32>
    %22 = math.tanh %21 : vector<128x128xf32>
    %23 = arith.truncf %22 : vector<128x128xf32> to vector<128x128xbf16>
    %c2 = arith.constant 2 : index
    %c0_19 = arith.constant 0 : index
    %c0_20 = arith.constant 0 : index
    %24 = vector.load %arg2[%c2, %c0_19, %c0_20] : memref<6x128x128xbf16, #tpu.memory_space<vmem>>, vector<1x128x128xbf16>
    %25 = vector.shape_cast %24 : vector<1x128x128xbf16> to vector<128x128xbf16>
    %cst_21 = arith.constant dense<0.000000e+00> : vector<128x128xf32>
    %26 = tpu.matmul %23, %25, %cst_21 {dimension_numbers = #tpu.dot_dimension_numbers<[1], [0], [0], [1], [0, 0, 1, 1], [], []>} : vector<128x128xbf16>, vector<128x128xbf16>, vector<128x128xf32> -> vector<128x128xf32>
    %c2_22 = arith.constant 2 : index
    %c0_23 = arith.constant 0 : index
    %c0_24 = arith.constant 0 : index
    %27 = vector.load %arg3[%c2_22, %c0_23, %c0_24] : memref<6x1x128xf32, #tpu.memory_space<vmem>>, vector<1x1x128xf32>
    %28 = vector.shape_cast %27 : vector<1x1x128xf32> to vector<1x128xf32>
    %29 = vector.broadcast %28 : vector<1x128xf32> to vector<128x128xf32>
    %30 = arith.addf %26, %29 : vector<128x128xf32>
    %31 = math.tanh %30 : vector<128x128xf32>
    %32 = arith.truncf %31 : vector<128x128xf32> to vector<128x128xbf16>
    %c3 = arith.constant 3 : index
    %c0_25 = arith.constant 0 : index
    %c0_26 = arith.constant 0 : index
    %33 = vector.load %arg2[%c3, %c0_25, %c0_26] : memref<6x128x128xbf16, #tpu.memory_space<vmem>>, vector<1x128x128xbf16>
    %34 = vector.shape_cast %33 : vector<1x128x128xbf16> to vector<128x128xbf16>
    %cst_27 = arith.constant dense<0.000000e+00> : vector<128x128xf32>
    %35 = tpu.matmul %32, %34, %cst_27 {dimension_numbers = #tpu.dot_dimension_numbers<[1], [0], [0], [1], [0, 0, 1, 1], [], []>} : vector<128x128xbf16>, vector<128x128xbf16>, vector<128x128xf32> -> vector<128x128xf32>
    %c3_28 = arith.constant 3 : index
    %c0_29 = arith.constant 0 : index
    %c0_30 = arith.constant 0 : index
    %36 = vector.load %arg3[%c3_28, %c0_29, %c0_30] : memref<6x1x128xf32, #tpu.memory_space<vmem>>, vector<1x1x128xf32>
    %37 = vector.shape_cast %36 : vector<1x1x128xf32> to vector<1x128xf32>
    %38 = vector.broadcast %37 : vector<1x128xf32> to vector<128x128xf32>
    %39 = arith.addf %35, %38 : vector<128x128xf32>
    %40 = math.tanh %39 : vector<128x128xf32>
    %41 = arith.truncf %40 : vector<128x128xf32> to vector<128x128xbf16>
    %c4 = arith.constant 4 : index
    %c0_31 = arith.constant 0 : index
    %c0_32 = arith.constant 0 : index
    %42 = vector.load %arg2[%c4, %c0_31, %c0_32] : memref<6x128x128xbf16, #tpu.memory_space<vmem>>, vector<1x128x128xbf16>
    %43 = vector.shape_cast %42 : vector<1x128x128xbf16> to vector<128x128xbf16>
    %cst_33 = arith.constant dense<0.000000e+00> : vector<128x128xf32>
    %44 = tpu.matmul %41, %43, %cst_33 {dimension_numbers = #tpu.dot_dimension_numbers<[1], [0], [0], [1], [0, 0, 1, 1], [], []>} : vector<128x128xbf16>, vector<128x128xbf16>, vector<128x128xf32> -> vector<128x128xf32>
    %c4_34 = arith.constant 4 : index
    %c0_35 = arith.constant 0 : index
    %c0_36 = arith.constant 0 : index
    %45 = vector.load %arg3[%c4_34, %c0_35, %c0_36] : memref<6x1x128xf32, #tpu.memory_space<vmem>>, vector<1x1x128xf32>
    %46 = vector.shape_cast %45 : vector<1x1x128xf32> to vector<1x128xf32>
    %47 = vector.broadcast %46 : vector<1x128xf32> to vector<128x128xf32>
    %48 = arith.addf %44, %47 : vector<128x128xf32>
    %49 = math.tanh %48 : vector<128x128xf32>
    %50 = arith.truncf %49 : vector<128x128xf32> to vector<128x128xbf16>
    %c5 = arith.constant 5 : index
    %c0_37 = arith.constant 0 : index
    %c0_38 = arith.constant 0 : index
    %51 = vector.load %arg2[%c5, %c0_37, %c0_38] : memref<6x128x128xbf16, #tpu.memory_space<vmem>>, vector<1x128x128xbf16>
    %52 = vector.shape_cast %51 : vector<1x128x128xbf16> to vector<128x128xbf16>
    %cst_39 = arith.constant dense<0.000000e+00> : vector<128x128xf32>
    %53 = tpu.matmul %50, %52, %cst_39 {dimension_numbers = #tpu.dot_dimension_numbers<[1], [0], [0], [1], [0, 0, 1, 1], [], []>} : vector<128x128xbf16>, vector<128x128xbf16>, vector<128x128xf32> -> vector<128x128xf32>
    %c5_40 = arith.constant 5 : index
    %c0_41 = arith.constant 0 : index
    %c0_42 = arith.constant 0 : index
    %54 = vector.load %arg3[%c5_40, %c0_41, %c0_42] : memref<6x1x128xf32, #tpu.memory_space<vmem>>, vector<1x1x128xf32>
    %55 = vector.shape_cast %54 : vector<1x1x128xf32> to vector<1x128xf32>
    %56 = vector.broadcast %55 : vector<1x128xf32> to vector<128x128xf32>
    %57 = arith.addf %53, %56 : vector<128x128xf32>
    %58 = math.tanh %57 : vector<128x128xf32>
    %59 = vector.extract_strided_slice %58 {offsets = [0, 0], sizes = [128, 32], strides = [1, 1]} : vector<128x128xf32> to vector<128x32xf32>
    %c0_43 = arith.constant 0 : index
    %c0_44 = arith.constant 0 : index
    %60 = vector.load %arg4[%c0_43, %c0_44] : memref<128x32xf32, #tpu.memory_space<vmem>>, vector<128x32xf32>
    tpu.vector_store %arg4[%c0_43, %c0_44], %59 {strides = array<i32>} : memref<128x32xf32, #tpu.memory_space<vmem>>, vector<128x32xf32>,
    return
  }
  func.func @transform_0(%arg0: i32) -> (i32, i32) {
    %c0_i32 = arith.constant 0 : i32
    %c0_i32_0 = arith.constant 0 : i32
    return %arg0, %c0_i32 : i32, i32
  }
  func.func @transform_1(%arg0: i32) -> (i32, i32, i32) {
    %c0_i32 = arith.constant 0 : i32
    %c0_i32_0 = arith.constant 0 : i32
    %c0_i32_1 = arith.constant 0 : i32
    %c0_i32_2 = arith.constant 0 : i32
    return %c0_i32, %c0_i32_0, %c0_i32_1 : i32, i32, i32
  }
  func.func @transform_2(%arg0: i32) -> (i32, i32, i32) {
    %c0_i32 = arith.constant 0 : i32
    %c0_i32_0 = arith.constant 0 : i32
    %c0_i32_1 = arith.constant 0 : i32
    %c0_i32_2 = arith.constant 0 : i32
    return %c0_i32, %c0_i32_0, %c0_i32_1 : i32, i32, i32
  }
  func.func @transform_3(%arg0: i32) -> (i32, i32) {
    %c0_i32 = arith.constant 0 : i32
    %c0_i32_0 = arith.constant 0 : i32
    return %arg0, %c0_i32 : i32, i32
  }
}

</mosaic_0001>

<bundles_post_ra>
// kernel: mida_forward.1
= control target key start
LH: loop header
LB: loop body
LE: loop exit
PB: predicated region body
PF: predicated region fallthrough
CT: control target
= control target key end

     0   :  { %8 = vsyncpa [#allocation4], 0  ;;  %s2188_s12 = smov 0   ;;  %s2374_s0 = inlined_call_operand.vmem [shape: f32[256,32], index: 0, kind: input, shape index: {}]   ;;  %s2375_s1 = inlined_call_operand.hbm [shape: bf16[6,128,128], index: 1, kind: input, shape index: {}]   ;;  %s2376_s2 = inlined_call_operand.vmem [shape: f32[6,1,128], index: 2, kind: input, shape index: {}]   ;;  %s2377_s3 = inlined_call_operand.vmem [shape: f32[256,32], index: 3, kind: output, shape index: {}]  }
   0x1 LB: > { %s1502_s13 = sadd.s32 4294967295, %s2162_s12   ;;  %p1504_p0 = scmp.ge.s32.totalorder %s2162_s12, 1  ;;  %s2162_s12 = sphi %s2188_s12, %s14_s12  }
   0x2   : > { %p113_p1 = scmp.lt.s32.totalorder %s2162_s12, 3  ;;  %s2164_s14 = smov [#allocation3]  }
   0x3   : > { %s125_s15 = sshll.u32 %s2164_s14, 4  ;;  %p2202_p3 = scmp.eq.s32.totalorder %s1502_s13, 0  ;;  %s126_s15 = int_to_ptr.vmem [resolvable:$true] %s125_s15 }
   0x4   : > { %p2196_p2 = pnand %p1504_p0, %p113_p1  ;;  %s2124_s21 = scalar_lea.hbm %s2375_s1, 6144 }
   0x5   : > { %s2382_s17 = scalar_select %p2202_p3, 1, 0 }
   0x6   : > { %s2381_s16 = scalar_select %p2196_p2, 1, 0 }
   0x7   : > { %p1866_p4 = pneg %p2196_p2  ;;  %p2125_p6 = scmp.ne.s32.totalorder %s2375_s1, %s2124_s21 }
   0x8   : > { %p2131_p10 = scmp.lt.u32.totalorder %s2124_s21, %s2375_s1 }
   0x9   : > { %p2210_p5 = pnand %p2202_p3, %p1866_p4 }
   0xb   : > { %p2126_p7 = pneg %p2210_p5 }
   0xd   : > { %p2127_p8 = pnand %p2126_p7, %p2125_p6 }
   0xf   : > { %p2128_p9 = pneg %p2127_p8 }
  0x11   : > { %p2133_p11 = pnand %p2131_p10, %p2128_p9 }
  0x13   : > { %2136 = shalt.err (!%p2133_p11)
}
  0x14   : > { %s2137_s26 = scalar_lea.vmem %s126_s15, 6144  ;;  %p2145_p1 = scmp.lt.s32.totalorder %s126_s15, %s126_s15 }
  0x15   : > { %p2138_p12 = scmp.ne.s32.totalorder %s126_s15, %s2137_s26  ;;  %p2146_p4 = scmp.lt.s32.totalorder %s2137_s26, %s2137_s26 }
  0x17   : > { %p2140_p13 = pnand %p2138_p12, %p2126_p7  ;;  %p2147_p3 = por %p2146_p4, %p2145_p1 }
  0x19   : > { %p2141_p0 = pneg %p2140_p13 }
  0x1b   : > { %p2148_p2 = pnand %p2147_p3, %p2141_p0 }
  0x1d   : > { %2151 = shalt.err (!%p2148_p2)
}
  0x1e   : > { %s2165_s27 = smov 64   ;;  %s2166_s28 = smov 4  }
  0x1f   : > { %1869 = dma.hbm_to_vmem [thread:$0]  (!%p2210_p5), %s2375_s1, 6144, %s126_s15, [#allocation4], %s2165_s27, %s2165_s27, %s2166_s28  }
  0x20   : > { %p2384_p6 = scmp.ne.s32.totalorder %s2381_s16, 0 }
  0x21   : > { %p2385_p8 = scmp.ne.s32.totalorder (!%p2384_p6), %s2382_s17, 0 }
  0x22   : > { %153 = sbr.rel (%p2384_p6) target bundleno = 1483 (0x5cb), region = 32 }
  0x29   : > { %2157 = dma.done.wait (%p2385_p8), [#allocation4], 6144  }
  0x2a   : > { %2159 = vsyncadd (%p2385_p8), [#allocation4], 4294961152  ;;  %s1509_s4 = sshll.u32 %s1502_s13, 4  ;;  %v1884_v0 = vld [vmem:[#allocation3] sm:$0xff]   ;;  %v1885_v1 = vld [vmem:[#allocation3 + $0x8] sm:$0xff]   ;;  %vm206_vm0 = vcmask 261120  }
  0x2b   : > { %p178_p2 = scmp.lt.s32.totalorder %s1509_s4, 31  ;;  %1670 = vmatprep.subr.bf16.mxu0 %v1884_v0  ;;  %v1886_v2 = vld [vmem:[#allocation3 + $0x10] sm:$0xff]   ;;  %vm223_vm1 = vcmask 1047808   ;;  %v1887_v3 = vld [vmem:[#allocation3 + $0x18] sm:$0xff]   ;;  %v1888_v10 = vld [vmem:[#allocation3 + $0x20] sm:$0xff]   ;;  %v2167_v11 = vmov 0.0  }
  0x2c   : > { %1671 = vmatpush3.bf16.msra.mxu0 %v1884_v0  ;;  %v1892_v22 = vld [vmem:[#allocation3 + $0x40] sm:$0xff]   ;;  %v1893_v23 = vld [vmem:[#allocation3 + $0x48] sm:$0xff]   ;;  %v1894_v28 = vld [vmem:[#allocation3 + $0x50] sm:$0xff]  }
  0x2d   : > { %s2387_s4 = smov (!%p178_p2, %s1509_s4), 31  ;;  %1672 = vmatprep.subr.bf16.mxu0 %v1885_v1  ;;  %v1889_v24 = vld [vmem:[#allocation3 + $0x28] sm:$0xff]   ;;  %1702 = vmatprep.subr.bf16.mxu1 %v1892_v22  ;;  %v1890_v29 = vld [vmem:[#allocation3 + $0x30] sm:$0xff]   ;;  %v1891_v30 = vld [vmem:[#allocation3 + $0x38] sm:$0xff]  }
  0x2e   : > { %s1510_s5 = sshll.u32 %s2387_s4, 3  ;;  %1703 = vmatpush3.bf16.msra.mxu1 %v1892_v22  ;;  %v1895_v52 = vld [vmem:[#allocation3 + $0x58] sm:$0xff]   ;;  %v1896_v53 = vld [vmem:[#allocation3 + $0x60] sm:$0xff]   ;;  %v1897_v54 = vld [vmem:[#allocation3 + $0x68] sm:$0xff]  }
  0x2f   : > { %s2246_s8 = scalar_lea.vmem %s2374_s0, %s1510_s5  ;;  %1704 = vmatprep.subr.bf16.mxu1 %v1893_v23  ;;  %v1898_v55 = vld [vmem:[#allocation3 + $0x70] sm:$0xff]   ;;  %v1899_v56 = vld [vmem:[#allocation3 + $0x78] sm:$0xff]   ;;  %v1900_v57 = vld [vmem:[#allocation3 + $0x80] sm:$0xff]   ;;  %s2327_s24 = scalar_lea.vmem %s2377_s3, %s1510_s5 }
  0x30   : > { %1673 = vmatpush3.bf16.msra.mxu0 %v1885_v1  ;;  %v190_v4 = vld [vmem:[%s2246_s8] sm:$0xff]  ;;  %v191_v5 = vld [vmem:[%s2246_s8 + $0x8] sm:$0xff]  ;;  %v192_v6 = vld [vmem:[%s2246_s8 + $0x10] sm:$0xff] }
  0x31   : > { %1674 = vmatprep.subr.bf16.mxu0 %v1886_v2  ;;  %207 = vst.msk [vmem:[#allocation2] sm:$0xff] %vm206_vm0, %v190_v4  ;;  %208 = vst.msk [vmem:[#allocation2 + $0x8] sm:$0xff] %vm206_vm0, %v191_v5  ;;  %v193_v7 = vld [vmem:[%s2246_s8 + $0x18] sm:$0xff]  ;;  %v194_v8 = vld [vmem:[%s2246_s8 + $0x20] sm:$0xff] }
  0x32   : > { %209 = vst.msk [vmem:[#allocation2 + $0x10] sm:$0xff] %vm206_vm0, %v192_v6  ;;  %v195_v9 = vld [vmem:[%s2246_s8 + $0x28] sm:$0xff]  ;;  %210 = vst.msk [vmem:[#allocation2 + $0x18] sm:$0xff] %vm206_vm0, %v193_v7  ;;  %v196_v12 = vld [vmem:[%s2246_s8 + $0x30] sm:$0xff]  ;;  %1705 = vmatpush3.bf16.msra.mxu1 %v1893_v23 }
  0x33   : > { %224 = vst.msk [vmem:[#allocation2] sm:$0xff] %vm223_vm1, %v2167_v11  ;;  %225 = vst.msk [vmem:[#allocation2 + $0x8] sm:$0xff] %vm223_vm1, %v2167_v11  ;;  %v197_v13 = vld [vmem:[%s2246_s8 + $0x38] sm:$0xff]  ;;  %v198_v14 = vld [vmem:[%s2246_s8 + $0x40] sm:$0xff]  ;;  %1706 = vmatprep.subr.bf16.mxu1 %v1894_v28 }
  0x34   : > { %226 = vst.msk [vmem:[#allocation2 + $0x10] sm:$0xff] %vm223_vm1, %v2167_v11  ;;  %1675 = vmatpush3.bf16.msra.mxu0 %v1886_v2  ;;  %227 = vst.msk [vmem:[#allocation2 + $0x18] sm:$0xff] %vm223_vm1, %v2167_v11  ;;  %v199_v15 = vld [vmem:[%s2246_s8 + $0x48] sm:$0xff]  ;;  %v200_v16 = vld [vmem:[%s2246_s8 + $0x50] sm:$0xff] }
  0x35   : > { %211 = vst.msk [vmem:[#allocation2 + $0x20] sm:$0xff] %vm206_vm0, %v194_v8  ;;  %212 = vst.msk [vmem:[#allocation2 + $0x28] sm:$0xff] %vm206_vm0, %v195_v9  ;;  %v201_v17 = vld [vmem:[%s2246_s8 + $0x58] sm:$0xff]  ;;  %1676 = vmatprep.subr.bf16.mxu0 %v1887_v3  ;;  %v202_v18 = vld [vmem:[%s2246_s8 + $0x60] sm:$0xff] }
  0x36   : > { %228 = vst.msk [vmem:[#allocation2 + $0x20] sm:$0xff] %vm223_vm1, %v2167_v11  ;;  %229 = vst.msk [vmem:[#allocation2 + $0x28] sm:$0xff] %vm223_vm1, %v2167_v11  ;;  %v203_v19 = vld [vmem:[%s2246_s8 + $0x68] sm:$0xff]  ;;  %v204_v20 = vld [vmem:[%s2246_s8 + $0x70] sm:$0xff]  ;;  %1707 = vmatpush3.bf16.msra.mxu1 %v1894_v28 }
  0x37   : > { %213 = vst.msk [vmem:[#allocation2 + $0x30] sm:$0xff] %vm206_vm0, %v196_v12  ;;  %214 = vst.msk [vmem:[#allocation2 + $0x38] sm:$0xff] %vm206_vm0, %v197_v13  ;;  %v205_v21 = vld [vmem:[%s2246_s8 + $0x78] sm:$0xff]  ;;  %1708 = vmatprep.subr.bf16.mxu1 %v1895_v52  ;;  %v1901_v58 = vld [vmem:[#allocation3 + $0x88] sm:$0xff]  }
  0x38   : > { %215 = vst.msk [vmem:[#allocation2 + $0x40] sm:$0xff] %vm206_vm0, %v198_v14  ;;  %216 = vst.msk [vmem:[#allocation2 + $0x48] sm:$0xff] %vm206_vm0, %v199_v15  ;;  %1677 = vmatpush3.bf16.msra.mxu0 %v1887_v3  ;;  %v1902_v59 = vld [vmem:[#allocation3 + $0x90] sm:$0xff]   ;;  %v1903_v60 = vld [vmem:[#allocation3 + $0x98] sm:$0xff]  }
  0x39   : > { %230 = vst.msk [vmem:[#allocation2 + $0x30] sm:$0xff] %vm223_vm1, %v2167_v11  ;;  %231 = vst.msk [vmem:[#allocation2 + $0x38] sm:$0xff] %vm223_vm1, %v2167_v11  ;;  %1678 = vmatprep.subr.bf16.mxu0 %v1888_v10  ;;  %v1513_v61 = vld [vmem:[%s2376_s2] ss:$0 sm:$0xff] }
  0x3a   : > { %232 = vst.msk [vmem:[#allocation2 + $0x40] sm:$0xff] %vm223_vm1, %v2167_v11  ;;  %233 = vst.msk [vmem:[#allocation2 + $0x48] sm:$0xff] %vm223_vm1, %v2167_v11  ;;  %v240_v25 = vld [vmem:[#allocation2] sm:$0xff]  ;;  %v241_v26 = vld [vmem:[#allocation2 + $0x8] sm:$0xff]  ;;  %1709 = vmatpush3.bf16.msra.mxu1 %v1895_v52 }
  0x3b   : > { %217 = vst.msk [vmem:[#allocation2 + $0x50] sm:$0xff] %vm206_vm0, %v200_v16  ;;  %218 = vst.msk [vmem:[#allocation2 + $0x58] sm:$0xff] %vm206_vm0, %v201_v17  ;;  %v256_v27 = vpack.c.bf16 %v241_v26, %v240_v25  ;;  %v242_v31 = vld [vmem:[#allocation2 + $0x10] sm:$0xff]  ;;  %v243_v32 = vld [vmem:[#allocation2 + $0x18] sm:$0xff]  ;;  %1710 = vmatprep.subr.bf16.mxu1 %v1896_v53 }
  0x3c   : > { %234 = vst.msk [vmem:[#allocation2 + $0x50] sm:$0xff] %vm223_vm1, %v2167_v11  ;;  %235 = vst.msk [vmem:[#allocation2 + $0x58] sm:$0xff] %vm223_vm1, %v2167_v11  ;;  %1679 = vmatpush3.bf16.msra.mxu0 %v1888_v10  ;;  %v257_v35 = vpack.c.bf16 %v243_v32, %v242_v31 }
  0x3d   : > { %219 = vst.msk [vmem:[#allocation2 + $0x60] sm:$0xff] %vm206_vm0, %v202_v18  ;;  %220 = vst.msk [vmem:[#allocation2 + $0x68] sm:$0xff] %vm206_vm0, %v203_v19  ;;  %1680 = vmatprep.subr.bf16.mxu0 %v1889_v24  ;;  %1686 = vmatprep.mubr.bf16.mxu0 %v256_v27  ;;  %v244_v33 = vld [vmem:[#allocation2 + $0x20] sm:$0xff]  ;;  %v245_v34 = vld [vmem:[#allocation2 + $0x28] sm:$0xff] }
  0x3e   : > { %221 = vst.msk [vmem:[#allocation2 + $0x70] sm:$0xff] %vm206_vm0, %v204_v20  ;;  %222 = vst.msk [vmem:[#allocation2 + $0x78] sm:$0xff] %vm206_vm0, %v205_v21  ;;  %v258_v36 = vpack.c.bf16 %v245_v34, %v244_v33  ;;  %1711 = vmatpush3.bf16.msra.mxu1 %v1896_v53 }
  0x3f   : > { %236 = vst.msk [vmem:[#allocation2 + $0x60] sm:$0xff] %vm223_vm1, %v2167_v11  ;;  %237 = vst.msk [vmem:[#allocation2 + $0x68] sm:$0xff] %vm223_vm1, %v2167_v11  ;;  %1712 = vmatprep.subr.bf16.mxu1 %v1897_v54 }
  0x40   : > { %238 = vst.msk [vmem:[#allocation2 + $0x70] sm:$0xff] %vm223_vm1, %v2167_v11  ;;  %239 = vst.msk [vmem:[#allocation2 + $0x78] sm:$0xff] %vm223_vm1, %v2167_v11  ;;  %1681 = vmatpush3.bf16.msra.mxu0 %v1889_v24  ;;  %v246_v37 = vld [vmem:[#allocation2 + $0x30] sm:$0xff]  ;;  %v247_v38 = vld [vmem:[#allocation2 + $0x38] sm:$0xff] }
  0x41   : > { %1682 = vmatprep.subr.bf16.mxu0 %v1890_v29  ;;  %v248_v39 = vld [vmem:[#allocation2 + $0x40] sm:$0xff]  ;;  %v249_v40 = vld [vmem:[#allocation2 + $0x48] sm:$0xff]  ;;  %v259_v41 = vpack.c.bf16 %v247_v38, %v246_v37 }
  0x42   : > { %v260_v42 = vpack.c.bf16 %v249_v40, %v248_v39  ;;  %1713 = vmatpush3.bf16.msra.mxu1 %v1897_v54  ;;  %v1904_v54 = vld [vmem:[#allocation3 + $0xa0] sm:$0xff]  }
  0x43   : > { %v250_v43 = vld [vmem:[#allocation2 + $0x50] sm:$0xff]  ;;  %v251_v44 = vld [vmem:[#allocation2 + $0x58] sm:$0xff]  ;;  %1714 = vmatprep.subr.bf16.mxu1 %v1898_v55 }
  0x44   : > { %1683 = vmatpush3.bf16.msra.mxu0 %v1890_v29  ;;  %v261_v47 = vpack.c.bf16 %v251_v44, %v250_v43 }
  0x45   : > { %1684 = vmatprep.subr.bf16.mxu0 %v1891_v30 }
  0x46   : > { %v252_v45 = vld [vmem:[#allocation2 + $0x60] sm:$0xff]  ;;  %v253_v46 = vld [vmem:[#allocation2 + $0x68] sm:$0xff]  ;;  %1715 = vmatpush3.bf16.msra.mxu1 %v1898_v55 }
  0x47   : > { %v262_v48 = vpack.c.bf16 %v253_v46, %v252_v45  ;;  %v254_v49 = vld [vmem:[#allocation2 + $0x70] sm:$0xff]  ;;  %v255_v50 = vld [vmem:[#allocation2 + $0x78] sm:$0xff]  ;;  %1716 = vmatprep.subr.bf16.mxu1 %v1899_v56  ;;  %v1905_v55 = vld [vmem:[#allocation3 + $0xa8] sm:$0xff]  }
  0x48   : > { %1685 = vmatpush3.bf16.msra.mxu0 %v1891_v30  ;;  %v263_v51 = vpack.c.bf16 %v255_v50, %v254_v49 }
  0x49   : > { %1734 = vmatprep.subr.bf16.mxu0 %v1900_v57 }
  0x4a   : > { %1717 = vmatpush3.bf16.msra.mxu1 %v1899_v56  ;;  %v1906_v56 = vld [vmem:[#allocation3 + $0xb0] sm:$0xff]  }
  0x4b   : > { %1687 = vmatmul.mubr.bf16.vlgmr.msra.gmra.mrb[0].mxu0 %v257_v35 }
  0x4c   : > { %1690 = vmatprep.mubr.bf16.mxu0 %v258_v36  ;;  %1735 = vmatpush3.bf16.msra.mxu0 %v1900_v57  ;;  %v1907_v57 = vld [vmem:[#allocation3 + $0xb8] sm:$0xff]  }
  0x4d   : > { %1736 = vmatprep.subr.bf16.mxu0 %v1901_v58 }
  0x50   : > { %1737 = vmatpush3.bf16.msra.mxu0 %v1901_v58  ;;  %v1908_v58 = vld [vmem:[#allocation3 + $0xc0] sm:$0xff]  }
  0x51   : > { %1738 = vmatprep.subr.bf16.mxu0 %v1902_v59  ;;  %1766 = vmatprep.subr.bf16.mxu1 %v1908_v58 }
  0x53   : > { %1691 = vmatmul.mubr.bf16.gmra.mrb[4].mxu0 %v259_v41 }
  0x54   : > { %1694 = vmatprep.mubr.bf16.mxu0 %v260_v42  ;;  %1739 = vmatpush3.bf16.msra.mxu0 %v1902_v59  ;;  %v1909_v59 = vld [vmem:[#allocation3 + $0xc8] sm:$0xff]  }
  0x55   : > { %1740 = vmatprep.subr.bf16.mxu0 %v1903_v60 }
  0x58   : > { %1741 = vmatpush3.bf16.msra.mxu0 %v1903_v60  ;;  %v1910_v60 = vld [vmem:[#allocation3 + $0xd0] sm:$0xff]  }
  0x59   : > { %1742 = vmatprep.subr.bf16.mxu0 %v1904_v54 }
  0x5b   : > { %1695 = vmatmul.mubr.bf16.gmra.mrb[8].mxu0 %v261_v47 }
  0x5c   : > { %1698 = vmatprep.mubr.bf16.mxu0 %v262_v48  ;;  %1743 = vmatpush3.bf16.msra.mxu0 %v1904_v54 }
  0x5d   : > { %1744 = vmatprep.subr.bf16.mxu0 %v1905_v55 }
  0x60   : > { %1745 = vmatpush3.bf16.msra.mxu0 %v1905_v55  ;;  %v1912_v55 = vld [vmem:[#allocation3 + $0xe0] sm:$0xff]  }
  0x61   : > { %1746 = vmatprep.subr.bf16.mxu0 %v1906_v56 }
  0x63   : > { %1699 = vmatmul.mubr.bf16.gmra.mrb[12].mxu0 %v263_v51 }
  0x64   : > { %1747 = vmatpush3.bf16.msra.mxu0 %v1906_v56  ;;  %v1913_v56 = vld [vmem:[#allocation3 + $0xe8] sm:$0xff]  }
  0x65   : > { %1748 = vmatprep.subr.bf16.mxu0 %v1907_v57 }
  0x68   : > { %1749 = vmatpush3.bf16.msra.mxu0 %v1907_v57  ;;  %v1914_v57 = vld [vmem:[#allocation3 + $0xf0] sm:$0xff]  }
 0x11e   : > { %v1688_v62 = vpop.f32.mrb[0].mxu0 }
 0x11f   : > { %v378_v63 = vadd.f32 %v1688_v62, %v1513_v61  ;;  %v369_v0 = vpop.f32.mrb[1].mxu0  ;;  %v1523_v62 = vld [vmem:[%s2376_s2 + $0x1] ss:$0 sm:$0xff] }
 0x120   : > { %v370_v1 = vadd.f32 %v1513_v61, %v369_v0  ;;  %v1689_v2 = vpop.f32.mrb[2].mxu0 }
 0x121   : > { %1932 = vtanh.f32 %v378_v63  ;;  %v381_v3 = vadd.f32 %v1689_v2, %v1513_v61  ;;  %v372_v4 = vpop.f32.mrb[3].mxu0 }
 0x122   : > { %1934 = vtanh.f32 %v370_v1  ;;  %v373_v5 = vadd.f32 %v1513_v61, %v372_v4 }
 0x123   : > { %1936 = vtanh.f32 %v381_v3 }
 0x124   : > { %1938 = vtanh.f32 %v373_v5 }
 0x126   : > { %v1692_v6 = vpop.f32.mrb[4].mxu0 }
 0x127   : > { %v394_v7 = vadd.f32 %v1692_v6, %v1513_v61  ;;  %v385_v8 = vpop.f32.mrb[5].mxu0 }
 0x128   : > { %v386_v9 = vadd.f32 %v1513_v61, %v385_v8  ;;  %v1693_v10 = vpop.f32.mrb[6].mxu0 }
 0x129   : > { %1940 = vtanh.f32 %v394_v7  ;;  %v397_v11 = vadd.f32 %v1693_v10, %v1513_v61  ;;  %v388_v12 = vpop.f32.mrb[7].mxu0 }
 0x12a   : > { %1942 = vtanh.f32 %v386_v9  ;;  %v389_v13 = vadd.f32 %v1513_v61, %v388_v12 }
 0x12b   : > { %v1933_v14 = vpop.eup %1932  ;;  %1944 = vtanh.f32 %v397_v11 }
 0x12c   : > { %v1935_v15 = vpop.eup %1934  ;;  %1946 = vtanh.f32 %v389_v13 }
 0x12d   : > { %v1937_v16 = vpop.eup %1936 }
 0x12e   : > { %v1939_v17 = vpop.eup %1938  ;;  %v1696_v18 = vpop.f32.mrb[8].mxu0  ;;  %v449_v19 = vpack.c.bf16 %v1937_v16, %v1933_v14 }
 0x12f   : > { %v410_v20 = vadd.f32 %v1696_v18, %v1513_v61  ;;  %v401_v21 = vpop.f32.mrb[9].mxu0  ;;  %v448_v22 = vpack.c.bf16 %v1939_v17, %v1935_v15 }
 0x130   : > { %v402_v23 = vadd.f32 %v1513_v61, %v401_v21  ;;  %v1697_v24 = vpop.f32.mrb[10].mxu0 }
 0x131   : > { %1948 = vtanh.f32 %v410_v20  ;;  %v413_v25 = vadd.f32 %v1697_v24, %v1513_v61  ;;  %v404_v26 = vpop.f32.mrb[11].mxu0  ;;  %1718 = vmatprep.mubr.bf16.mxu1 %v448_v22 }
 0x132   : > { %1950 = vtanh.f32 %v402_v23  ;;  %v405_v27 = vadd.f32 %v1513_v61, %v404_v26  ;;  %1719 = vmatmul.mubr.bf16.vlgmr.msra.gmra.mrb[0].mxu1 %v449_v19 }
 0x133   : > { %v1941_v28 = vpop.eup %1940  ;;  %1952 = vtanh.f32 %v413_v25  ;;  %1767 = vmatpush3.bf16.msra.mxu1 %v1908_v58  ;;  %v1915_v58 = vld [vmem:[#allocation3 + $0xf8] sm:$0xff]  }
 0x134   : > { %v1943_v29 = vpop.eup %1942  ;;  %1954 = vtanh.f32 %v405_v27  ;;  %1768 = vmatprep.subr.bf16.mxu1 %v1909_v59 }
 0x135   : > { %v1945_v30 = vpop.eup %1944 }
 0x136   : > { %v1947_v31 = vpop.eup %1946  ;;  %v1700_v32 = vpop.f32.mrb[12].mxu0  ;;  %v451_v33 = vpack.c.bf16 %v1945_v30, %v1941_v28 }
 0x137   : > { %v426_v34 = vadd.f32 %v1700_v32, %v1513_v61  ;;  %v417_v35 = vpop.f32.mrb[13].mxu0  ;;  %v450_v36 = vpack.c.bf16 %v1947_v31, %v1943_v29  ;;  %1769 = vmatpush3.bf16.msra.mxu1 %v1909_v59  ;;  %v1916_v59 = vld [vmem:[#allocation3 + $0x100] sm:$0xff]  }
 0x138   : > { %v418_v37 = vadd.f32 %v1513_v61, %v417_v35  ;;  %v1701_v38 = vpop.f32.mrb[14].mxu0  ;;  %1770 = vmatprep.subr.bf16.mxu1 %v1910_v60  ;;  %1798 = vmatprep.subr.bf16.mxu0 %v1916_v59 }
 0x139   : > { %1956 = vtanh.f32 %v426_v34  ;;  %v429_v39 = vadd.f32 %v1701_v38, %v1513_v61  ;;  %v420_v40 = vpop.f32.mrb[15].mxu0  ;;  %1722 = vmatprep.mubr.bf16.mxu1 %v450_v36 }
 0x13a   : > { %1958 = vtanh.f32 %v418_v37  ;;  %v421_v41 = vadd.f32 %v1513_v61, %v420_v40  ;;  %1723 = vmatmul.mubr.bf16.gmra.mrb[4].mxu1 %v451_v33  ;;  %v1911_v61 = vld [vmem:[#allocation3 + $0xd8] sm:$0xff]  }
 0x13b   : > { %v1949_v42 = vpop.eup %1948  ;;  %1960 = vtanh.f32 %v429_v39  ;;  %1771 = vmatpush3.bf16.msra.mxu1 %v1910_v60  ;;  %v1917_v60 = vld [vmem:[#allocation3 + $0x108] sm:$0xff]  }
 0x13c   : > { %v1951_v43 = vpop.eup %1950  ;;  %1962 = vtanh.f32 %v421_v41  ;;  %1772 = vmatprep.subr.bf16.mxu1 %v1911_v61 }
 0x13d   : > { %v1953_v44 = vpop.eup %1952 }
 0x13e   : > { %v1955_v45 = vpop.eup %1954  ;;  %v453_v46 = vpack.c.bf16 %v1953_v44, %v1949_v42 }
 0x13f   : > { %v452_v47 = vpack.c.bf16 %v1955_v45, %v1951_v43  ;;  %1773 = vmatpush3.bf16.msra.mxu1 %v1911_v61  ;;  %v1918_v61 = vld [vmem:[#allocation3 + $0x110] sm:$0xff]  }
 0x140   : > { %1774 = vmatprep.subr.bf16.mxu1 %v1912_v55 }
 0x141   : > { %1726 = vmatprep.mubr.bf16.mxu1 %v452_v47 }
 0x142   : > { %1727 = vmatmul.mubr.bf16.gmra.mrb[8].mxu1 %v453_v46 }
 0x143   : > { %v1957_v48 = vpop.eup %1956  ;;  %1775 = vmatpush3.bf16.msra.mxu1 %v1912_v55 }
 0x144   : > { %v1959_v49 = vpop.eup %1958  ;;  %1776 = vmatprep.subr.bf16.mxu1 %v1913_v56 }
 0x145   : > { %v1961_v50 = vpop.eup %1960 }
 0x146   : > { %v1963_v51 = vpop.eup %1962  ;;  %v455_v52 = vpack.c.bf16 %v1961_v50, %v1957_v48 }
 0x147   : > { %v454_v53 = vpack.c.bf16 %v1963_v51, %v1959_v49  ;;  %1777 = vmatpush3.bf16.msra.mxu1 %v1913_v56  ;;  %v1920_v56 = vld [vmem:[#allocation3 + $0x120] sm:$0xff]  }
 0x148   : > { %1778 = vmatprep.subr.bf16.mxu1 %v1914_v57 }
 0x149   : > { %1730 = vmatprep.mubr.bf16.mxu1 %v454_v53 }
 0x14a   : > { %1731 = vmatmul.mubr.bf16.gmra.mrb[12].mxu1 %v455_v52 }
 0x14b   : > { %1779 = vmatpush3.bf16.msra.mxu1 %v1914_v57  ;;  %v1921_v57 = vld [vmem:[#allocation3 + $0x128] sm:$0xff]  }
 0x14c   : > { %1780 = vmatprep.subr.bf16.mxu1 %v1915_v58 }
 0x14f   : > { %1781 = vmatpush3.bf16.msra.mxu1 %v1915_v58  ;;  %v1922_v58 = vld [vmem:[#allocation3 + $0x130] sm:$0xff]  }
 0x205   : > { %v1720_v63 = vpop.f32.mrb[0].mxu1 }
 0x206   : > { %v572_v0 = vadd.f32 %v1720_v63, %v1523_v62  ;;  %v563_v1 = vpop.f32.mrb[1].mxu1  ;;  %v1533_v63 = vld [vmem:[%s2376_s2 + $0x2] ss:$0 sm:$0xff] }
 0x207   : > { %v564_v2 = vadd.f32 %v1523_v62, %v563_v1  ;;  %v1721_v3 = vpop.f32.mrb[2].mxu1 }
 0x208   : > { %1964 = vtanh.f32 %v572_v0  ;;  %v575_v4 = vadd.f32 %v1721_v3, %v1523_v62  ;;  %v566_v5 = vpop.f32.mrb[3].mxu1 }
 0x209   : > { %1966 = vtanh.f32 %v564_v2  ;;  %v567_v6 = vadd.f32 %v1523_v62, %v566_v5 }
 0x20a   : > { %1968 = vtanh.f32 %v575_v4 }
 0x20b   : > { %1970 = vtanh.f32 %v567_v6 }
 0x20d   : > { %v1724_v7 = vpop.f32.mrb[4].mxu1 }
 0x20e   : > { %v588_v8 = vadd.f32 %v1724_v7, %v1523_v62  ;;  %v579_v9 = vpop.f32.mrb[5].mxu1 }
 0x20f   : > { %v580_v10 = vadd.f32 %v1523_v62, %v579_v9  ;;  %v1725_v11 = vpop.f32.mrb[6].mxu1 }
 0x210   : > { %1972 = vtanh.f32 %v588_v8  ;;  %v591_v12 = vadd.f32 %v1725_v11, %v1523_v62  ;;  %v582_v13 = vpop.f32.mrb[7].mxu1 }
 0x211   : > { %1974 = vtanh.f32 %v580_v10  ;;  %v583_v14 = vadd.f32 %v1523_v62, %v582_v13 }
 0x212   : > { %v1965_v15 = vpop.eup %1964  ;;  %1976 = vtanh.f32 %v591_v12 }
 0x213   : > { %v1967_v16 = vpop.eup %1966  ;;  %1978 = vtanh.f32 %v583_v14 }
 0x214   : > { %v1969_v17 = vpop.eup %1968 }
 0x215   : > { %v1971_v18 = vpop.eup %1970  ;;  %v1728_v19 = vpop.f32.mrb[8].mxu1  ;;  %v643_v20 = vpack.c.bf16 %v1969_v17, %v1965_v15 }
 0x216   : > { %v604_v21 = vadd.f32 %v1728_v19, %v1523_v62  ;;  %v595_v22 = vpop.f32.mrb[9].mxu1  ;;  %v642_v23 = vpack.c.bf16 %v1971_v18, %v1967_v16 }
 0x217   : > { %v596_v24 = vadd.f32 %v1523_v62, %v595_v22  ;;  %v1729_v25 = vpop.f32.mrb[10].mxu1 }
 0x218   : > { %1980 = vtanh.f32 %v604_v21  ;;  %v607_v26 = vadd.f32 %v1729_v25, %v1523_v62  ;;  %v598_v27 = vpop.f32.mrb[11].mxu1  ;;  %1750 = vmatprep.mubr.bf16.mxu0 %v642_v23 }
 0x219   : > { %1982 = vtanh.f32 %v596_v24  ;;  %v599_v28 = vadd.f32 %v1523_v62, %v598_v27  ;;  %1751 = vmatmul.mubr.bf16.vlgmr.msra.gmra.mrb[16].mxu0 %v643_v20 }
 0x21a   : > { %v1973_v29 = vpop.eup %1972  ;;  %1984 = vtanh.f32 %v607_v26  ;;  %1799 = vmatpush3.bf16.msra.mxu0 %v1916_v59  ;;  %v1923_v59 = vld [vmem:[#allocation3 + $0x138] sm:$0xff]  }
 0x21b   : > { %v1975_v30 = vpop.eup %1974  ;;  %1986 = vtanh.f32 %v599_v28  ;;  %1800 = vmatprep.subr.bf16.mxu0 %v1917_v60 }
 0x21c   : > { %v1977_v31 = vpop.eup %1976 }
 0x21d   : > { %v1979_v32 = vpop.eup %1978  ;;  %v1732_v33 = vpop.f32.mrb[12].mxu1  ;;  %v645_v34 = vpack.c.bf16 %v1977_v31, %v1973_v29 }
 0x21e   : > { %v620_v35 = vadd.f32 %v1732_v33, %v1523_v62  ;;  %v611_v36 = vpop.f32.mrb[13].mxu1  ;;  %v644_v37 = vpack.c.bf16 %v1979_v32, %v1975_v30  ;;  %1801 = vmatpush3.bf16.msra.mxu0 %v1917_v60  ;;  %v1924_v60 = vld [vmem:[#allocation3 + $0x140] sm:$0xff]  }
 0x21f   : > { %v612_v38 = vadd.f32 %v1523_v62, %v611_v36  ;;  %v1733_v39 = vpop.f32.mrb[14].mxu1  ;;  %1802 = vmatprep.subr.bf16.mxu0 %v1918_v61  ;;  %1830 = vmatprep.subr.bf16.mxu1 %v1924_v60 }
 0x220   : > { %1988 = vtanh.f32 %v620_v35  ;;  %v623_v40 = vadd.f32 %v1733_v39, %v1523_v62  ;;  %v614_v41 = vpop.f32.mrb[15].mxu1  ;;  %1754 = vmatprep.mubr.bf16.mxu0 %v644_v37 }
 0x221   : > { %1990 = vtanh.f32 %v612_v38  ;;  %v615_v42 = vadd.f32 %v1523_v62, %v614_v41  ;;  %1755 = vmatmul.mubr.bf16.gmra.mrb[20].mxu0 %v645_v34  ;;  %v1919_v62 = vld [vmem:[#allocation3 + $0x118] sm:$0xff]  }
 0x222   : > { %v1981_v43 = vpop.eup %1980  ;;  %1992 = vtanh.f32 %v623_v40  ;;  %1803 = vmatpush3.bf16.msra.mxu0 %v1918_v61  ;;  %v1925_v61 = vld [vmem:[#allocation3 + $0x148] sm:$0xff]  }
 0x223   : > { %v1983_v44 = vpop.eup %1982  ;;  %1994 = vtanh.f32 %v615_v42  ;;  %1804 = vmatprep.subr.bf16.mxu0 %v1919_v62 }
 0x224   : > { %v1985_v45 = vpop.eup %1984 }
 0x225   : > { %v1987_v46 = vpop.eup %1986  ;;  %v647_v47 = vpack.c.bf16 %v1985_v45, %v1981_v43 }
 0x226   : > { %v646_v48 = vpack.c.bf16 %v1987_v46, %v1983_v44  ;;  %1805 = vmatpush3.bf16.msra.mxu0 %v1919_v62  ;;  %v1926_v62 = vld [vmem:[#allocation3 + $0x150] sm:$0xff]  }
 0x227   : > { %1806 = vmatprep.subr.bf16.mxu0 %v1920_v56 }
 0x228   : > { %1758 = vmatprep.mubr.bf16.mxu0 %v646_v48 }
 0x229   : > { %1759 = vmatmul.mubr.bf16.gmra.mrb[24].mxu0 %v647_v47 }
 0x22a   : > { %v1989_v49 = vpop.eup %1988  ;;  %1807 = vmatpush3.bf16.msra.mxu0 %v1920_v56 }
 0x22b   : > { %v1991_v50 = vpop.eup %1990  ;;  %1808 = vmatprep.subr.bf16.mxu0 %v1921_v57 }
 0x22c   : > { %v1993_v51 = vpop.eup %1992 }
 0x22d   : > { %v1995_v52 = vpop.eup %1994  ;;  %v649_v53 = vpack.c.bf16 %v1993_v51, %v1989_v49 }
 0x22e   : > { %v648_v54 = vpack.c.bf16 %v1995_v52, %v1991_v50  ;;  %1809 = vmatpush3.bf16.msra.mxu0 %v1921_v57  ;;  %v1928_v57 = vld [vmem:[#allocation3 + $0x160] sm:$0xff]  }
 0x22f   : > { %1810 = vmatprep.subr.bf16.mxu0 %v1922_v58 }
 0x230   : > { %1762 = vmatprep.mubr.bf16.mxu0 %v648_v54 }
 0x231   : > { %1763 = vmatmul.mubr.bf16.gmra.mrb[28].mxu0 %v649_v53 }
 0x232   : > { %1811 = vmatpush3.bf16.msra.mxu0 %v1922_v58  ;;  %v1929_v58 = vld [vmem:[#allocation3 + $0x168] sm:$0xff]  }
 0x233   : > { %1812 = vmatprep.subr.bf16.mxu0 %v1923_v59 }
 0x236   : > { %1813 = vmatpush3.bf16.msra.mxu0 %v1923_v59  ;;  %v1930_v59 = vld [vmem:[#allocation3 + $0x170] sm:$0xff]  }
 0x2ec   : > { %v1752_v0 = vpop.f32.mrb[16].mxu0 }
 0x2ed   : > { %v766_v1 = vadd.f32 %v1752_v0, %v1533_v63  ;;  %v757_v2 = vpop.f32.mrb[17].mxu0  ;;  %v1543_v0 = vld [vmem:[%s2376_s2 + $0x3] ss:$0 sm:$0xff] }
 0x2ee   : > { %v758_v3 = vadd.f32 %v1533_v63, %v757_v2  ;;  %v1753_v4 = vpop.f32.mrb[18].mxu0 }
 0x2ef   : > { %1996 = vtanh.f32 %v766_v1  ;;  %v769_v5 = vadd.f32 %v1753_v4, %v1533_v63  ;;  %v760_v6 = vpop.f32.mrb[19].mxu0 }
 0x2f0   : > { %1998 = vtanh.f32 %v758_v3  ;;  %v761_v7 = vadd.f32 %v1533_v63, %v760_v6 }
 0x2f1   : > { %2000 = vtanh.f32 %v769_v5 }
 0x2f2   : > { %2002 = vtanh.f32 %v761_v7 }
 0x2f4   : > { %v1756_v8 = vpop.f32.mrb[20].mxu0 }
 0x2f5   : > { %v782_v9 = vadd.f32 %v1756_v8, %v1533_v63  ;;  %v773_v10 = vpop.f32.mrb[21].mxu0 }
 0x2f6   : > { %v774_v11 = vadd.f32 %v1533_v63, %v773_v10  ;;  %v1757_v12 = vpop.f32.mrb[22].mxu0 }
 0x2f7   : > { %2004 = vtanh.f32 %v782_v9  ;;  %v785_v13 = vadd.f32 %v1757_v12, %v1533_v63  ;;  %v776_v14 = vpop.f32.mrb[23].mxu0 }
 0x2f8   : > { %2006 = vtanh.f32 %v774_v11  ;;  %v777_v15 = vadd.f32 %v1533_v63, %v776_v14 }
 0x2f9   : > { %v1997_v16 = vpop.eup %1996  ;;  %2008 = vtanh.f32 %v785_v13 }
 0x2fa   : > { %v1999_v17 = vpop.eup %1998  ;;  %2010 = vtanh.f32 %v777_v15 }
 0x2fb   : > { %v2001_v18 = vpop.eup %2000 }
 0x2fc   : > { %v2003_v19 = vpop.eup %2002  ;;  %v1760_v20 = vpop.f32.mrb[24].mxu0  ;;  %v837_v21 = vpack.c.bf16 %v2001_v18, %v1997_v16 }
 0x2fd   : > { %v798_v22 = vadd.f32 %v1760_v20, %v1533_v63  ;;  %v789_v23 = vpop.f32.mrb[25].mxu0  ;;  %v836_v24 = vpack.c.bf16 %v2003_v19, %v1999_v17 }
 0x2fe   : > { %v790_v25 = vadd.f32 %v1533_v63, %v789_v23  ;;  %v1761_v26 = vpop.f32.mrb[26].mxu0 }
 0x2ff   : > { %2012 = vtanh.f32 %v798_v22  ;;  %v801_v27 = vadd.f32 %v1761_v26, %v1533_v63  ;;  %v792_v28 = vpop.f32.mrb[27].mxu0  ;;  %1782 = vmatprep.mubr.bf16.mxu1 %v836_v24 }
 0x300   : > { %2014 = vtanh.f32 %v790_v25  ;;  %v793_v29 = vadd.f32 %v1533_v63, %v792_v28  ;;  %1783 = vmatmul.mubr.bf16.vlgmr.msra.gmra.mrb[16].mxu1 %v837_v21 }
 0x301   : > { %v2005_v30 = vpop.eup %2004  ;;  %2016 = vtanh.f32 %v801_v27  ;;  %1831 = vmatpush3.bf16.msra.mxu1 %v1924_v60  ;;  %v1931_v60 = vld [vmem:[#allocation3 + $0x178] sm:$0xff]  }
 0x302   : > { %v2007_v31 = vpop.eup %2006  ;;  %2018 = vtanh.f32 %v793_v29  ;;  %1832 = vmatprep.subr.bf16.mxu1 %v1925_v61 }
 0x303   : > { %v2009_v32 = vpop.eup %2008 }
 0x304   : > { %v2011_v33 = vpop.eup %2010  ;;  %v1764_v34 = vpop.f32.mrb[28].mxu0  ;;  %v839_v35 = vpack.c.bf16 %v2009_v32, %v2005_v30 }
 0x305   : > { %v814_v36 = vadd.f32 %v1764_v34, %v1533_v63  ;;  %v805_v37 = vpop.f32.mrb[29].mxu0  ;;  %v838_v38 = vpack.c.bf16 %v2011_v33, %v2007_v31  ;;  %1833 = vmatpush3.bf16.msra.mxu1 %v1925_v61  ;;  %v1553_v61 = vld [vmem:[%s2376_s2 + $0x4] ss:$0 sm:$0xff] }
 0x306   : > { %v806_v39 = vadd.f32 %v1533_v63, %v805_v37  ;;  %v1765_v40 = vpop.f32.mrb[30].mxu0  ;;  %1834 = vmatprep.subr.bf16.mxu1 %v1926_v62 }
 0x307   : > { %2020 = vtanh.f32 %v814_v36  ;;  %v817_v41 = vadd.f32 %v1765_v40, %v1533_v63  ;;  %v808_v42 = vpop.f32.mrb[31].mxu0  ;;  %1786 = vmatprep.mubr.bf16.mxu1 %v838_v38 }
 0x308   : > { %2022 = vtanh.f32 %v806_v39  ;;  %v809_v43 = vadd.f32 %v1533_v63, %v808_v42  ;;  %1787 = vmatmul.mubr.bf16.gmra.mrb[20].mxu1 %v839_v35  ;;  %v1927_v63 = vld [vmem:[#allocation3 + $0x158] sm:$0xff]  }
 0x309   : > { %v2013_v44 = vpop.eup %2012  ;;  %2024 = vtanh.f32 %v817_v41  ;;  %1835 = vmatpush3.bf16.msra.mxu1 %v1926_v62 }
 0x30a   : > { %v2015_v45 = vpop.eup %2014  ;;  %2026 = vtanh.f32 %v809_v43  ;;  %1836 = vmatprep.subr.bf16.mxu1 %v1927_v63 }
 0x30b   : > { %v2017_v46 = vpop.eup %2016 }
 0x30c   : > { %v2019_v47 = vpop.eup %2018  ;;  %v841_v48 = vpack.c.bf16 %v2017_v46, %v2013_v44 }
 0x30d   : > { %v840_v49 = vpack.c.bf16 %v2019_v47, %v2015_v45  ;;  %1837 = vmatpush3.bf16.msra.mxu1 %v1927_v63 }
 0x30e   : > { %1838 = vmatprep.subr.bf16.mxu1 %v1928_v57 }
 0x30f   : > { %1790 = vmatprep.mubr.bf16.mxu1 %v840_v49 }
 0x310   : > { %1791 = vmatmul.mubr.bf16.gmra.mrb[24].mxu1 %v841_v48 }
 0x311   : > { %v2021_v50 = vpop.eup %2020  ;;  %1839 = vmatpush3.bf16.msra.mxu1 %v1928_v57 }
 0x312   : > { %v2023_v51 = vpop.eup %2022  ;;  %1840 = vmatprep.subr.bf16.mxu1 %v1929_v58 }
 0x313   : > { %v2025_v52 = vpop.eup %2024 }
 0x314   : > { %v2027_v53 = vpop.eup %2026  ;;  %v843_v54 = vpack.c.bf16 %v2025_v52, %v2021_v50 }
 0x315   : > { %v842_v55 = vpack.c.bf16 %v2027_v53, %v2023_v51  ;;  %1841 = vmatpush3.bf16.msra.mxu1 %v1929_v58 }
 0x316   : > { %1842 = vmatprep.subr.bf16.mxu1 %v1930_v59 }
 0x317   : > { %1794 = vmatprep.mubr.bf16.mxu1 %v842_v55 }
 0x318   : > { %1795 = vmatmul.mubr.bf16.gmra.mrb[28].mxu1 %v843_v54 }
 0x319   : > { %1843 = vmatpush3.bf16.msra.mxu1 %v1930_v59 }
 0x31a   : > { %1844 = vmatprep.subr.bf16.mxu1 %v1931_v60 }
 0x31d   : > { %1845 = vmatpush3.bf16.msra.mxu1 %v1931_v60 }
 0x3d3   : > { %v1784_v1 = vpop.f32.mrb[16].mxu1 }
 0x3d4   : > { %v960_v2 = vadd.f32 %v1784_v1, %v1543_v0  ;;  %v951_v3 = vpop.f32.mrb[17].mxu1 }
 0x3d5   : > { %v952_v4 = vadd.f32 %v1543_v0, %v951_v3  ;;  %v1785_v5 = vpop.f32.mrb[18].mxu1 }
 0x3d6   : > { %2028 = vtanh.f32 %v960_v2  ;;  %v963_v6 = vadd.f32 %v1785_v5, %v1543_v0  ;;  %v954_v7 = vpop.f32.mrb[19].mxu1 }
 0x3d7   : > { %2030 = vtanh.f32 %v952_v4  ;;  %v955_v8 = vadd.f32 %v1543_v0, %v954_v7 }
 0x3d8   : > { %2032 = vtanh.f32 %v963_v6 }
 0x3d9   : > { %2034 = vtanh.f32 %v955_v8 }
 0x3db   : > { %v1788_v9 = vpop.f32.mrb[20].mxu1 }
 0x3dc   : > { %v976_v10 = vadd.f32 %v1788_v9, %v1543_v0  ;;  %v967_v11 = vpop.f32.mrb[21].mxu1 }
 0x3dd   : > { %v968_v12 = vadd.f32 %v1543_v0, %v967_v11  ;;  %v1789_v13 = vpop.f32.mrb[22].mxu1 }
 0x3de   : > { %2036 = vtanh.f32 %v976_v10  ;;  %v979_v14 = vadd.f32 %v1789_v13, %v1543_v0  ;;  %v970_v15 = vpop.f32.mrb[23].mxu1 }
 0x3df   : > { %2038 = vtanh.f32 %v968_v12  ;;  %v971_v16 = vadd.f32 %v1543_v0, %v970_v15 }
 0x3e0   : > { %v2029_v17 = vpop.eup %2028  ;;  %2040 = vtanh.f32 %v979_v14 }
 0x3e1   : > { %v2031_v18 = vpop.eup %2030  ;;  %2042 = vtanh.f32 %v971_v16 }
 0x3e2   : > { %v2033_v19 = vpop.eup %2032 }
 0x3e3   : > { %v2035_v20 = vpop.eup %2034  ;;  %v1792_v21 = vpop.f32.mrb[24].mxu1  ;;  %v1031_v22 = vpack.c.bf16 %v2033_v19, %v2029_v17 }
 0x3e4   : > { %v992_v23 = vadd.f32 %v1792_v21, %v1543_v0  ;;  %v983_v24 = vpop.f32.mrb[25].mxu1  ;;  %v1030_v25 = vpack.c.bf16 %v2035_v20, %v2031_v18 }
 0x3e5   : > { %v984_v26 = vadd.f32 %v1543_v0, %v983_v24  ;;  %v1793_v27 = vpop.f32.mrb[26].mxu1 }
 0x3e6   : > { %2044 = vtanh.f32 %v992_v23  ;;  %v995_v28 = vadd.f32 %v1793_v27, %v1543_v0  ;;  %v986_v29 = vpop.f32.mrb[27].mxu1  ;;  %1814 = vmatprep.mubr.bf16.mxu0 %v1030_v25 }
 0x3e7   : > { %2046 = vtanh.f32 %v984_v26  ;;  %v987_v30 = vadd.f32 %v1543_v0, %v986_v29  ;;  %1815 = vmatmul.mubr.bf16.vlgmr.msra.gmra.mrb[32].mxu0 %v1031_v22 }
 0x3e8   : > { %v2037_v31 = vpop.eup %2036  ;;  %2048 = vtanh.f32 %v995_v28 }
 0x3e9   : > { %v2039_v32 = vpop.eup %2038  ;;  %2050 = vtanh.f32 %v987_v30 }
 0x3ea   : > { %v2041_v33 = vpop.eup %2040 }
 0x3eb   : > { %v2043_v34 = vpop.eup %2042  ;;  %v1796_v35 = vpop.f32.mrb[28].mxu1  ;;  %v1033_v36 = vpack.c.bf16 %v2041_v33, %v2037_v31 }
 0x3ec   : > { %v1008_v37 = vadd.f32 %v1796_v35, %v1543_v0  ;;  %v999_v38 = vpop.f32.mrb[29].mxu1  ;;  %v1032_v39 = vpack.c.bf16 %v2043_v34, %v2039_v32 }
 0x3ed   : > { %v1000_v40 = vadd.f32 %v1543_v0, %v999_v38  ;;  %v1797_v41 = vpop.f32.mrb[30].mxu1 }
 0x3ee   : > { %2052 = vtanh.f32 %v1008_v37  ;;  %v1011_v42 = vadd.f32 %v1797_v41, %v1543_v0  ;;  %v1002_v43 = vpop.f32.mrb[31].mxu1  ;;  %1818 = vmatprep.mubr.bf16.mxu0 %v1032_v39 }
 0x3ef   : > { %2054 = vtanh.f32 %v1000_v40  ;;  %v1003_v44 = vadd.f32 %v1543_v0, %v1002_v43  ;;  %1819 = vmatmul.mubr.bf16.gmra.mrb[36].mxu0 %v1033_v36 }
 0x3f0   : > { %v2045_v45 = vpop.eup %2044  ;;  %2056 = vtanh.f32 %v1011_v42 }
 0x3f1   : > { %v2047_v46 = vpop.eup %2046  ;;  %2058 = vtanh.f32 %v1003_v44 }
 0x3f2   : > { %v2049_v47 = vpop.eup %2048 }
 0x3f3   : > { %v2051_v48 = vpop.eup %2050  ;;  %v1035_v49 = vpack.c.bf16 %v2049_v47, %v2045_v45 }
 0x3f4   : > { %v1034_v50 = vpack.c.bf16 %v2051_v48, %v2047_v46 }
 0x3f6   : > { %1822 = vmatprep.mubr.bf16.mxu0 %v1034_v50 }
 0x3f7   : > { %1823 = vmatmul.mubr.bf16.gmra.mrb[40].mxu0 %v1035_v49 }
 0x3f8   : > { %v2053_v51 = vpop.eup %2052 }
 0x3f9   : > { %v2055_v52 = vpop.eup %2054 }
 0x3fa   : > { %v2057_v53 = vpop.eup %2056 }
 0x3fb   : > { %v2059_v54 = vpop.eup %2058  ;;  %v1037_v55 = vpack.c.bf16 %v2057_v53, %v2053_v51 }
 0x3fc   : > { %v1036_v56 = vpack.c.bf16 %v2059_v54, %v2055_v52  ;;  %v2314_v54 = vld [vmem:[%s2376_s2 + $0x5] ss:$0 sm:$0xff] }
 0x3fe   : > { %1826 = vmatprep.mubr.bf16.mxu0 %v1036_v56 }
 0x3ff   : > { %1827 = vmatmul.mubr.bf16.gmra.mrb[44].mxu0 %v1037_v55 }
 0x4ba   : > { %v1816_v62 = vpop.f32.mrb[32].mxu0 }
 0x4bb   : > { %v1154_v63 = vadd.f32 %v1816_v62, %v1553_v61  ;;  %v1145_v0 = vpop.f32.mrb[33].mxu0 }
 0x4bc   : > { %v1146_v1 = vadd.f32 %v1553_v61, %v1145_v0  ;;  %v1817_v2 = vpop.f32.mrb[34].mxu0 }
 0x4bd   : > { %2060 = vtanh.f32 %v1154_v63  ;;  %v1157_v3 = vadd.f32 %v1817_v2, %v1553_v61  ;;  %v1148_v4 = vpop.f32.mrb[35].mxu0 }
 0x4be   : > { %2062 = vtanh.f32 %v1146_v1  ;;  %v1149_v5 = vadd.f32 %v1553_v61, %v1148_v4 }
 0x4bf   : > { %2064 = vtanh.f32 %v1157_v3 }
 0x4c0   : > { %2066 = vtanh.f32 %v1149_v5 }
 0x4c2   : > { %v1820_v6 = vpop.f32.mrb[36].mxu0 }
 0x4c3   : > { %v1170_v7 = vadd.f32 %v1820_v6, %v1553_v61  ;;  %v1161_v8 = vpop.f32.mrb[37].mxu0 }
 0x4c4   : > { %v1162_v9 = vadd.f32 %v1553_v61, %v1161_v8  ;;  %v1821_v10 = vpop.f32.mrb[38].mxu0 }
 0x4c5   : > { %2068 = vtanh.f32 %v1170_v7  ;;  %v1173_v11 = vadd.f32 %v1821_v10, %v1553_v61  ;;  %v1164_v12 = vpop.f32.mrb[39].mxu0 }
 0x4c6   : > { %2070 = vtanh.f32 %v1162_v9  ;;  %v1165_v13 = vadd.f32 %v1553_v61, %v1164_v12 }
 0x4c7   : > { %v2061_v14 = vpop.eup %2060  ;;  %2072 = vtanh.f32 %v1173_v11 }
 0x4c8   : > { %v2063_v15 = vpop.eup %2062  ;;  %2074 = vtanh.f32 %v1165_v13 }
 0x4c9   : > { %v2065_v16 = vpop.eup %2064 }
 0x4ca   : > { %v2067_v17 = vpop.eup %2066  ;;  %v1824_v18 = vpop.f32.mrb[40].mxu0  ;;  %v1225_v19 = vpack.c.bf16 %v2065_v16, %v2061_v14 }
 0x4cb   : > { %v1186_v20 = vadd.f32 %v1824_v18, %v1553_v61  ;;  %v1177_v21 = vpop.f32.mrb[41].mxu0  ;;  %v1224_v22 = vpack.c.bf16 %v2067_v17, %v2063_v15 }
 0x4cc   : > { %v1178_v23 = vadd.f32 %v1553_v61, %v1177_v21  ;;  %v1825_v24 = vpop.f32.mrb[42].mxu0 }
 0x4cd   : > { %2076 = vtanh.f32 %v1186_v20  ;;  %v1189_v25 = vadd.f32 %v1825_v24, %v1553_v61  ;;  %v1180_v26 = vpop.f32.mrb[43].mxu0  ;;  %1846 = vmatprep.mubr.bf16.mxu1 %v1224_v22 }
 0x4ce   : > { %2078 = vtanh.f32 %v1178_v23  ;;  %v1181_v27 = vadd.f32 %v1553_v61, %v1180_v26  ;;  %1847 = vmatmul.mubr.bf16.vlgmr.msra.gmra.mrb[32].mxu1 %v1225_v19 }
 0x4cf   : > { %v2069_v28 = vpop.eup %2068  ;;  %2080 = vtanh.f32 %v1189_v25 }
 0x4d0   : > { %v2071_v29 = vpop.eup %2070  ;;  %2082 = vtanh.f32 %v1181_v27 }
 0x4d1   : > { %v2073_v30 = vpop.eup %2072 }
 0x4d2   : > { %v2075_v31 = vpop.eup %2074  ;;  %v1828_v32 = vpop.f32.mrb[44].mxu0  ;;  %v1227_v33 = vpack.c.bf16 %v2073_v30, %v2069_v28 }
 0x4d3   : > { %v1202_v34 = vadd.f32 %v1828_v32, %v1553_v61  ;;  %v1193_v35 = vpop.f32.mrb[45].mxu0  ;;  %v1226_v36 = vpack.c.bf16 %v2075_v31, %v2071_v29 }
 0x4d4   : > { %v1194_v37 = vadd.f32 %v1553_v61, %v1193_v35  ;;  %v1829_v38 = vpop.f32.mrb[46].mxu0 }
 0x4d5   : > { %2084 = vtanh.f32 %v1202_v34  ;;  %v1205_v39 = vadd.f32 %v1829_v38, %v1553_v61  ;;  %v1196_v40 = vpop.f32.mrb[47].mxu0  ;;  %1850 = vmatprep.mubr.bf16.mxu1 %v1226_v36 }
 0x4d6   : > { %2086 = vtanh.f32 %v1194_v37  ;;  %v1197_v41 = vadd.f32 %v1553_v61, %v1196_v40  ;;  %1851 = vmatmul.mubr.bf16.gmra.mrb[36].mxu1 %v1227_v33 }
 0x4d7   : > { %v2077_v42 = vpop.eup %2076  ;;  %2088 = vtanh.f32 %v1205_v39 }
 0x4d8   : > { %v2079_v43 = vpop.eup %2078  ;;  %2090 = vtanh.f32 %v1197_v41 }
 0x4d9   : > { %v2081_v44 = vpop.eup %2080 }
 0x4da   : > { %v2083_v45 = vpop.eup %2082  ;;  %v1229_v46 = vpack.c.bf16 %v2081_v44, %v2077_v42 }
 0x4db   : > { %v1228_v47 = vpack.c.bf16 %v2083_v45, %v2079_v43 }
 0x4dd   : > { %1854 = vmatprep.mubr.bf16.mxu1 %v1228_v47 }
 0x4de   : > { %1855 = vmatmul.mubr.bf16.gmra.mrb[40].mxu1 %v1229_v46 }
 0x4df   : > { %v2085_v48 = vpop.eup %2084 }
 0x4e0   : > { %v2087_v49 = vpop.eup %2086 }
 0x4e1   : > { %v2089_v50 = vpop.eup %2088 }
 0x4e2   : > { %v2091_v51 = vpop.eup %2090  ;;  %v1231_v52 = vpack.c.bf16 %v2089_v50, %v2085_v48 }
 0x4e3   : > { %v1230_v53 = vpack.c.bf16 %v2091_v51, %v2087_v49 }
 0x4e5   : > { %1858 = vmatprep.mubr.bf16.mxu1 %v1230_v53 }
 0x4e6   : > { %1859 = vmatmul.mubr.bf16.gmra.mrb[44].mxu1 %v1231_v52 }
 0x5a1   : > { %v1848_v55 = vpop.f32.mrb[32].mxu1 }
 0x5a2   : > { %v1348_v56 = vadd.f32 %v1848_v55, %v2314_v54  ;;  %v1339_v57 = vpop.f32.mrb[33].mxu1 }
 0x5a3   : > { %v1340_v58 = vadd.f32 %v2314_v54, %v1339_v57  ;;  %v1849_v59 = vpop.f32.mrb[34].mxu1 }
 0x5a4   : > { %2092 = vtanh.f32 %v1348_v56  ;;  %v1351_v60 = vadd.f32 %v1849_v59, %v2314_v54  ;;  %v1342_v61 = vpop.f32.mrb[35].mxu1 }
 0x5a5   : > { %2094 = vtanh.f32 %v1340_v58  ;;  %v1343_v62 = vadd.f32 %v2314_v54, %v1342_v61 }
 0x5a6   : > { %2096 = vtanh.f32 %v1351_v60 }
 0x5a7   : > { %2098 = vtanh.f32 %v1343_v62 }
 0x5a9   : > { %v1852_v63 = vpop.f32.mrb[36].mxu1 }
 0x5aa   : > { %v1364_v0 = vadd.f32 %v1852_v63, %v2314_v54  ;;  %v1355_v1 = vpop.f32.mrb[37].mxu1 }
 0x5ab   : > { %v1356_v2 = vadd.f32 %v2314_v54, %v1355_v1  ;;  %v1853_v3 = vpop.f32.mrb[38].mxu1 }
 0x5ac   : > { %2100 = vtanh.f32 %v1364_v0  ;;  %v1367_v4 = vadd.f32 %v1853_v3, %v2314_v54  ;;  %v1358_v5 = vpop.f32.mrb[39].mxu1 }
 0x5ad   : > { %2102 = vtanh.f32 %v1356_v2  ;;  %v1359_v6 = vadd.f32 %v2314_v54, %v1358_v5 }
 0x5ae   : > { %v2093_v7 = vpop.eup %2092  ;;  %2104 = vtanh.f32 %v1367_v4 }
 0x5af   : > { %v2095_v8 = vpop.eup %2094  ;;  %1420 = vst.msk [vmem:[%s2327_s24 + $0x10] sm:$0xff] %vm206_vm0, %v2093_v7  ;;  %2106 = vtanh.f32 %v1359_v6 }
 0x5b0   : > { %v2097_v9 = vpop.eup %2096  ;;  %1418 = vst.msk [vmem:[%s2327_s24] sm:$0xff] %vm206_vm0, %v2095_v8 }
 0x5b1   : > { %v2099_v10 = vpop.eup %2098  ;;  %1421 = vst.msk [vmem:[%s2327_s24 + $0x18] sm:$0xff] %vm206_vm0, %v2097_v9  ;;  %v1856_v11 = vpop.f32.mrb[40].mxu1 }
 0x5b2   : > { %1419 = vst.msk [vmem:[%s2327_s24 + $0x8] sm:$0xff] %vm206_vm0, %v2099_v10  ;;  %v1380_v12 = vadd.f32 %v1856_v11, %v2314_v54  ;;  %v1371_v13 = vpop.f32.mrb[41].mxu1 }
 0x5b3   : > { %v1372_v14 = vadd.f32 %v2314_v54, %v1371_v13  ;;  %v1857_v15 = vpop.f32.mrb[42].mxu1 }
 0x5b4   : > { %2108 = vtanh.f32 %v1380_v12  ;;  %v1383_v16 = vadd.f32 %v1857_v15, %v2314_v54  ;;  %v1374_v17 = vpop.f32.mrb[43].mxu1 }
 0x5b5   : > { %2110 = vtanh.f32 %v1372_v14  ;;  %v1375_v18 = vadd.f32 %v2314_v54, %v1374_v17 }
 0x5b6   : > { %v2101_v19 = vpop.eup %2100  ;;  %2112 = vtanh.f32 %v1383_v16 }
 0x5b7   : > { %v2103_v20 = vpop.eup %2102  ;;  %1424 = vst.msk [vmem:[%s2327_s24 + $0x30] sm:$0xff] %vm206_vm0, %v2101_v19  ;;  %2114 = vtanh.f32 %v1375_v18 }
 0x5b8   : > { %v2105_v21 = vpop.eup %2104  ;;  %1422 = vst.msk [vmem:[%s2327_s24 + $0x20] sm:$0xff] %vm206_vm0, %v2103_v20 }
 0x5b9   : > { %v2107_v22 = vpop.eup %2106  ;;  %1425 = vst.msk [vmem:[%s2327_s24 + $0x38] sm:$0xff] %vm206_vm0, %v2105_v21  ;;  %v1860_v23 = vpop.f32.mrb[44].mxu1 }
 0x5ba   : > { %1423 = vst.msk [vmem:[%s2327_s24 + $0x28] sm:$0xff] %vm206_vm0, %v2107_v22  ;;  %v1396_v24 = vadd.f32 %v1860_v23, %v2314_v54  ;;  %v1387_v25 = vpop.f32.mrb[45].mxu1 }
 0x5bb   : > { %v1388_v26 = vadd.f32 %v2314_v54, %v1387_v25  ;;  %v1861_v27 = vpop.f32.mrb[46].mxu1 }
 0x5bc   : > { %2116 = vtanh.f32 %v1396_v24  ;;  %v1399_v28 = vadd.f32 %v1861_v27, %v2314_v54  ;;  %v1390_v29 = vpop.f32.mrb[47].mxu1 }
 0x5bd   : > { %2118 = vtanh.f32 %v1388_v26  ;;  %v1391_v30 = vadd.f32 %v2314_v54, %v1390_v29 }
 0x5be   : > { %v2109_v31 = vpop.eup %2108  ;;  %2120 = vtanh.f32 %v1399_v28 }
 0x5bf   : > { %v2111_v32 = vpop.eup %2110  ;;  %1428 = vst.msk [vmem:[%s2327_s24 + $0x50] sm:$0xff] %vm206_vm0, %v2109_v31  ;;  %2122 = vtanh.f32 %v1391_v30 }
 0x5c0   : > { %v2113_v33 = vpop.eup %2112  ;;  %1426 = vst.msk [vmem:[%s2327_s24 + $0x40] sm:$0xff] %vm206_vm0, %v2111_v32 }
 0x5c1   : > { %v2115_v34 = vpop.eup %2114  ;;  %1429 = vst.msk [vmem:[%s2327_s24 + $0x58] sm:$0xff] %vm206_vm0, %v2113_v33 }
 0x5c2   : > { %1427 = vst.msk [vmem:[%s2327_s24 + $0x48] sm:$0xff] %vm206_vm0, %v2115_v34 }
 0x5c6   : > { %v2117_v35 = vpop.eup %2116 }
 0x5c7   : > { %v2119_v36 = vpop.eup %2118  ;;  %1432 = vst.msk [vmem:[%s2327_s24 + $0x70] sm:$0xff] %vm206_vm0, %v2117_v35 }
 0x5c8   : > { %v2121_v37 = vpop.eup %2120  ;;  %1430 = vst.msk [vmem:[%s2327_s24 + $0x60] sm:$0xff] %vm206_vm0, %v2119_v36 }
 0x5c9   : > { %v2123_v38 = vpop.eup %2122  ;;  %1433 = vst.msk [vmem:[%s2327_s24 + $0x78] sm:$0xff] %vm206_vm0, %v2121_v37 }
 0x5ca   : > { %1431 = vst.msk [vmem:[%s2327_s24 + $0x68] sm:$0xff] %vm206_vm0, %v2123_v38 }
 0x5cb PF: > { %s14_s12 = sadd.s32 1, %s2162_s12  }
 0x5cc   : > { %p11_p3 = scmp.ge.s32.totalorder %s14_s12, 4  }
 0x5ce   :  { %13 = sbr.rel (!%p11_p3) target bundleno = 1 (0x1), region = 77 }
 0x5d5   :  { %1456 = vsyncpa [#allocation4], 1 }
 0x5d6   :  { %1458 = vsyncpa [#allocation4 + $0x1], 1 }

</bundles_post_ra>
